<compile_context>
chip_gen: v7x
topology: tpu7x:2x2x1
jax: 0.10.0
libtpu: 0.0.40
codegen_flags: <defaults>
</compile_context>

<pallas_src>
import functools

import jax
import jax.numpy as jnp
from jax.experimental import pallas as pl
from jax.experimental.pallas import tpu as pltpu


def _gcn_kernel(g_ref, x_ref, w_ref, b_ref, o_ref, *, K, n):
    # g_ref: (K*n, n)          -- all supports stacked along sublanes
    # x_ref: (n, B*d_in)       -- features, batch folded into lanes
    # w_ref: (K, B*d_in, LW)   -- per-support, per-batch block-diagonal weights
    # b_ref: (1, LW)           -- bias, tiled per batch, padded to LW
    # o_ref: (n, LW)           -- lane-dense output (LW multiple of 128)
    # One fat aggregation matmul covering every support and every batch.
    s_all = jnp.dot(g_ref[...], x_ref[...],
                    preferred_element_type=jnp.float32)        # (K*n, B*d_in)
    # Accumulator starts at the bias -> epilogue is just a max.
    acc = jnp.broadcast_to(b_ref[...], o_ref.shape).astype(jnp.float32)
    for k in range(K):  # static unroll over supports (K is small)
        s_k = s_all[k * n:(k + 1) * n, :]                      # static 8-aligned slice
        acc = acc + jnp.dot(s_k, w_ref[k],
                            preferred_element_type=jnp.float32)  # (n, LW)
    o_ref[...] = jnp.maximum(acc, 0.0).astype(o_ref.dtype)


def prepare_gcn_params(W, b, *, K, B, d_in, hidden):
    """Hoisted out of the per-forward hot path: do this once per weight update.

    Returns (w_bd, b_t, LW) with:
      w_bd[k, b*d_in + d, b*hidden + h] = W[k*d_in + d, h]   (block-diagonal over batch)
      b_t[0, b*hidden + h]              = b[h]
    and the concatenated B*hidden lane axis padded once to LW = roundup(B*hidden, 128).
    """
    LW = ((B * hidden + 127) // 128) * 128
    W3 = W.reshape(K, d_in, hidden)
    eyeB = jnp.eye(B, dtype=W.dtype)
    w_bd = jnp.einsum('bc,kdh->kbdch', eyeB, W3).reshape(K, B * d_in, B * hidden)
    w_bd = jnp.pad(w_bd, ((0, 0), (0, 0), (0, LW - B * hidden)))
    b_t = jnp.pad(jnp.tile(b, (B,)), (0, LW - B * hidden)).reshape(1, LW)
    return w_bd, b_t, LW


@functools.partial(jax.jit, static_argnames=("K", "n", "B", "d_in", "hidden"))
def gcn_forward(G2, x, w_bd, b_t, *, K, n, B, d_in, hidden):
    """G2: (K*n, n) flattened supports, x: (B, n, d_in), prepared w_bd/b_t."""
    LW = w_bd.shape[-1]

    # Fold batch into the lane dim: x_t[j, b*d_in + d] = x[b, j, d]
    x_t = jnp.transpose(x, (1, 0, 2)).reshape(n, B * d_in)

    # Actual kernel FLOPs / bytes (padded, block-diagonal projection included).
    flops = 2 * (K * n) * n * (B * d_in) + 2 * K * n * (B * d_in) * LW
    bytes_accessed = 4 * (G2.size + x_t.size + w_bd.size + b_t.size + n * LW)

    out_t = pl.pallas_call(
        functools.partial(_gcn_kernel, K=K, n=n),
        out_shape=jax.ShapeDtypeStruct((n, LW), jnp.float32),
        grid_spec=pltpu.PrefetchScalarGridSpec(
            num_scalar_prefetch=0,
            grid=(1,),  # single invocation: everything resident in VMEM
            in_specs=[
                pl.BlockSpec((K * n, n), lambda i: (0, 0)),            # G (stacked)
                pl.BlockSpec((n, B * d_in), lambda i: (0, 0)),         # x (batch in lanes)
                pl.BlockSpec((K, B * d_in, LW), lambda i: (0, 0, 0)),  # block-diag W
                pl.BlockSpec((1, LW), lambda i: (0, 0)),               # bias
            ],
            out_specs=pl.BlockSpec((n, LW), lambda i: (0, 0)),
        ),
        compiler_params=pltpu.CompilerParams(
            dimension_semantics=("arbitrary",)),
        cost_estimate=pl.CostEstimate(
            flops=flops, transcendentals=0, bytes_accessed=bytes_accessed),
    )(G2, x_t, w_bd, b_t)

    # (n, LW) -> (B, n, hidden): strip lane padding, put batch back in front.
    out = out_t[:, :B * hidden].reshape(n, B, hidden)
    return jnp.transpose(out, (1, 0, 2))


def gcn_reference(G, x, W, b):
    # pure-JAX reference mirroring the PyTorch einsums
    supports = [jnp.einsum('ij,bjp->bip', G[k], x) for k in range(G.shape[0])]
    support_cat = jnp.concatenate(supports, axis=-1)
    out = jnp.einsum('bip,pq->biq', support_cat, W) + b
    return jnp.maximum(out, 0.0)


if __name__ == "__main__":
    # Small shapes consistent with the module's forward signature.
    K, B, n_nodes, input_dim, hidden_dim = 3, 2, 16, 4, 32

    key = jax.random.PRNGKey(0)
    kG, kx, kW = jax.random.split(key, 3)

    G = jax.random.uniform(kG, (K, n_nodes, n_nodes), dtype=jnp.float32)
    x = jax.random.normal(kx, (B, n_nodes, input_dim), dtype=jnp.float32)

    # Deterministic Xavier-normal init for W (fan_in = K*input_dim, fan_out = hidden_dim)
    fan_in, fan_out = K * input_dim, hidden_dim
    xavier_std = (2.0 / (fan_in + fan_out)) ** 0.5
    W = xavier_std * jax.random.normal(kW, (fan_in, fan_out), dtype=jnp.float32)
    bias = jnp.zeros((hidden_dim,), dtype=jnp.float32)

    # Hoisted, per-weight-update preparation (not in the per-forward hot path).
    w_bd, b_t, _ = prepare_gcn_params(W, bias, K=K, B=B, d_in=input_dim,
                                      hidden=hidden_dim)
    G2 = G.reshape(K * n_nodes, n_nodes)

    out = gcn_forward(G2, x, w_bd, b_t, K=K, n=n_nodes, B=B,
                      d_in=input_dim, hidden=hidden_dim)
    out = jax.block_until_ready(out)

    ref = gcn_reference(G, x, W, bias)
    assert out.shape == (B, n_nodes, hidden_dim)
    assert jnp.allclose(out, ref, atol=1e-4, rtol=1e-4)

    print("KERNEL_OK")
</pallas_src>

<mosaic_0001>
module attributes {stable_mosaic.version = 11 : i64} {
  func.func @_gcn_kernel(%arg0: i32, %arg1: memref<48x16xf32, #tpu.memory_space<vmem>>, %arg2: memref<16x8xf32, #tpu.memory_space<vmem>>, %arg3: memref<3x8x128xf32, #tpu.memory_space<vmem>>, %arg4: memref<1x128xf32, #tpu.memory_space<vmem>>, %arg5: memref<16x128xf32, #tpu.memory_space<vmem>>) attributes {dimension_semantics = [#tpu.dimension_semantics<arbitrary>], iteration_bounds = array<i64: 1>, scalar_prefetch = 0 : i64, scratch_operands = 0 : i64, tpu.core_type = #tpu.core_type<tc>, window_params = [{pipeline_mode = #tpu.pipeline_mode<synchronous>, transform_indices = @transform_0, window_bounds = array<i64: 48, 16>}, {pipeline_mode = #tpu.pipeline_mode<synchronous>, transform_indices = @transform_1, window_bounds = array<i64: 16, 8>}, {pipeline_mode = #tpu.pipeline_mode<synchronous>, transform_indices = @transform_2, window_bounds = array<i64: 3, 8, 128>}, {pipeline_mode = #tpu.pipeline_mode<synchronous>, transform_indices = @transform_3, window_bounds = array<i64: 1, 128>}, {pipeline_mode = #tpu.pipeline_mode<synchronous>, transform_indices = @transform_4, window_bounds = array<i64: 16, 128>}]} {
    %c0 = arith.constant 0 : index
    %c0_0 = arith.constant 0 : index
    %0 = vector.load %arg1[%c0, %c0_0] : memref<48x16xf32, #tpu.memory_space<vmem>>, vector<48x16xf32>
    %c0_1 = arith.constant 0 : index
    %c0_2 = arith.constant 0 : index
    %1 = vector.load %arg2[%c0_1, %c0_2] : memref<16x8xf32, #tpu.memory_space<vmem>>, vector<16x8xf32>
    %cst = arith.constant dense<0.000000e+00> : vector<48x8xf32>
    %2 = tpu.matmul %0, %1, %cst {dimension_numbers = #tpu.dot_dimension_numbers<[1], [0], [0], [1], [0, 0, 1, 1], [], []>} : vector<48x16xf32>, vector<16x8xf32>, vector<48x8xf32> -> vector<48x8xf32>
    %c0_3 = arith.constant 0 : index
    %c0_4 = arith.constant 0 : index
    %3 = vector.load %arg4[%c0_3, %c0_4] : memref<1x128xf32, #tpu.memory_space<vmem>>, vector<1x128xf32>
    %4 = vector.shape_cast %3 : vector<1x128xf32> to vector<1x128xf32>
    %5 = vector.broadcast %4 : vector<1x128xf32> to vector<16x128xf32>
    %6 = vector.extract_strided_slice %2 {offsets = [0, 0], sizes = [16, 8], strides = [1, 1]} : vector<48x8xf32> to vector<16x8xf32>
    %c0_5 = arith.constant 0 : index
    %c0_6 = arith.constant 0 : index
    %c0_7 = arith.constant 0 : index
    %7 = vector.load %arg3[%c0_5, %c0_6, %c0_7] : memref<3x8x128xf32, #tpu.memory_space<vmem>>, vector<1x8x128xf32>
    %8 = vector.shape_cast %7 : vector<1x8x128xf32> to vector<8x128xf32>
    %cst_8 = arith.constant dense<0.000000e+00> : vector<16x128xf32>
    %9 = tpu.matmul %6, %8, %cst_8 {dimension_numbers = #tpu.dot_dimension_numbers<[1], [0], [0], [1], [0, 0, 1, 1], [], []>} : vector<16x8xf32>, vector<8x128xf32>, vector<16x128xf32> -> vector<16x128xf32>
    %10 = arith.addf %5, %9 : vector<16x128xf32>
    %11 = vector.extract_strided_slice %2 {offsets = [16, 0], sizes = [16, 8], strides = [1, 1]} : vector<48x8xf32> to vector<16x8xf32>
    %c1 = arith.constant 1 : index
    %c0_9 = arith.constant 0 : index
    %c0_10 = arith.constant 0 : index
    %12 = vector.load %arg3[%c1, %c0_9, %c0_10] : memref<3x8x128xf32, #tpu.memory_space<vmem>>, vector<1x8x128xf32>
    %13 = vector.shape_cast %12 : vector<1x8x128xf32> to vector<8x128xf32>
    %cst_11 = arith.constant dense<0.000000e+00> : vector<16x128xf32>
    %14 = tpu.matmul %11, %13, %cst_11 {dimension_numbers = #tpu.dot_dimension_numbers<[1], [0], [0], [1], [0, 0, 1, 1], [], []>} : vector<16x8xf32>, vector<8x128xf32>, vector<16x128xf32> -> vector<16x128xf32>
    %15 = arith.addf %10, %14 : vector<16x128xf32>
    %16 = vector.extract_strided_slice %2 {offsets = [32, 0], sizes = [16, 8], strides = [1, 1]} : vector<48x8xf32> to vector<16x8xf32>
    %c2 = arith.constant 2 : index
    %c0_12 = arith.constant 0 : index
    %c0_13 = arith.constant 0 : index
    %17 = vector.load %arg3[%c2, %c0_12, %c0_13] : memref<3x8x128xf32, #tpu.memory_space<vmem>>, vector<1x8x128xf32>
    %18 = vector.shape_cast %17 : vector<1x8x128xf32> to vector<8x128xf32>
    %cst_14 = arith.constant dense<0.000000e+00> : vector<16x128xf32>
    %19 = tpu.matmul %16, %18, %cst_14 {dimension_numbers = #tpu.dot_dimension_numbers<[1], [0], [0], [1], [0, 0, 1, 1], [], []>} : vector<16x8xf32>, vector<8x128xf32>, vector<16x128xf32> -> vector<16x128xf32>
    %20 = arith.addf %15, %19 : vector<16x128xf32>
    %cst_15 = arith.constant 0.000000e+00 : f32
    %21 = vector.broadcast %cst_15 : f32 to vector<16x128xf32>
    %22 = arith.maximumf %20, %21 : vector<16x128xf32>
    %c0_16 = arith.constant 0 : index
    %c0_17 = arith.constant 0 : index
    %23 = vector.load %arg5[%c0_16, %c0_17] : memref<16x128xf32, #tpu.memory_space<vmem>>, vector<16x128xf32>
    tpu.vector_store %arg5[%c0_16, %c0_17], %22 {strides = array<i32>} : memref<16x128xf32, #tpu.memory_space<vmem>>, vector<16x128xf32>,
    return
  }
  func.func @transform_0(%arg0: i32) -> (i32, i32) {
    %c0_i32 = arith.constant 0 : i32
    %c0_i32_0 = arith.constant 0 : i32
    %c0_i32_1 = arith.constant 0 : i32
    return %c0_i32, %c0_i32_0 : i32, i32
  }
  func.func @transform_1(%arg0: i32) -> (i32, i32) {
    %c0_i32 = arith.constant 0 : i32
    %c0_i32_0 = arith.constant 0 : i32
    %c0_i32_1 = arith.constant 0 : i32
    return %c0_i32, %c0_i32_0 : i32, i32
  }
  func.func @transform_2(%arg0: i32) -> (i32, i32, i32) {
    %c0_i32 = arith.constant 0 : i32
    %c0_i32_0 = arith.constant 0 : i32
    %c0_i32_1 = arith.constant 0 : i32
    %c0_i32_2 = arith.constant 0 : i32
    return %c0_i32, %c0_i32_0, %c0_i32_1 : i32, i32, i32
  }
  func.func @transform_3(%arg0: i32) -> (i32, i32) {
    %c0_i32 = arith.constant 0 : i32
    %c0_i32_0 = arith.constant 0 : i32
    %c0_i32_1 = arith.constant 0 : i32
    return %c0_i32, %c0_i32_0 : i32, i32
  }
  func.func @transform_4(%arg0: i32) -> (i32, i32) {
    %c0_i32 = arith.constant 0 : i32
    %c0_i32_0 = arith.constant 0 : i32
    %c0_i32_1 = arith.constant 0 : i32
    return %c0_i32, %c0_i32_0 : i32, i32
  }
}

</mosaic_0001>

<bundles_post_ra>
// kernel: gcn_forward.1
= control target key start
LH: loop header
LB: loop body
LE: loop exit
PB: predicated region body
PF: predicated region fallthrough
CT: control target
= control target key end

     0   :  { %vm25_vm0 = vcmask 130048   ;;  %vm147_vm1 = vcmask 64512   ;;  %s558_s1 = inlined_call_operand.vmem [shape: f32[16,8], index: 1, kind: input, shape index: {}]   ;;  %s559_s0 = inlined_call_operand.vmem [shape: f32[48,16], index: 0, kind: input, shape index: {}]   ;;  %s560_s2 = inlined_call_operand.vmem [shape: f32[3,8,128], index: 2, kind: input, shape index: {}]   ;;  %s561_s3 = inlined_call_operand.vmem [shape: f32[1,128], index: 3, kind: input, shape index: {}]   ;;  %s562_s4 = inlined_call_operand.vmem [shape: f32[16,128], index: 4, kind: output, shape index: {}]  }
   0x1   :  { %v23_v0 = vld [vmem:[%s558_s1] sm:$0xff]  ;;  %v24_v1 = vld [vmem:[%s558_s1 + $0x8] sm:$0xff]  ;;  %v19_v5 = vld [vmem:[%s559_s0 + $0x10] sm:$0xff] }
   0x2   :  { %v17_v2 = vld [vmem:[%s559_s0] sm:$0xff]  ;;  %v469_v3 = vpack.c.bf16 %v24_v1, %v23_v0  ;;  %v18_v4 = vld [vmem:[%s559_s0 + $0x8] sm:$0xff]  ;;  %v20_v6 = vld [vmem:[%s559_s0 + $0x18] sm:$0xff] }
   0x3   :  { %445 = vmatprep.mubr.msk.f32.mxu0 %vm25_vm0, %v17_v2  ;;  %v21_v7 = vld [vmem:[%s559_s0 + $0x20] sm:$0xff]  ;;  %v22_v8 = vld [vmem:[%s559_s0 + $0x28] sm:$0xff]  ;;  %v421_v13 = vld [vmem:[%s560_s2 + $0x10] sm:$0xff] }
   0x4   :  { %470 = vmatprep.subr.bf16.mxu0 %v469_v3  ;;  %v146_v9 = vld [vmem:[%s560_s2] sm:$0xff]  ;;  %v418_v10 = vld [vmem:[%s560_s2 + $0x8] sm:$0xff] }
   0x5   :  { %472 = vmatpush3.bf16.msra.mxu0 %v469_v3  ;;  %454 = vmatprep.subr.mxu1 %v146_v9  ;;  %v415_v18 = vld [vmem:[%s561_s3] ss:$0 sm:$0xff] }
   0x6   :  { %455 = vmatpush3.msra.mxu1 %v146_v9 }
   0x7   :  { %459 = vmatprep.subr.mxu1 %v418_v10 }
   0x8   :  { %446 = vmatmul.mubr.msk.f32.vlgmr.msra.gmra.mrb[0].mxu0 %vm25_vm0, %v18_v4 }
   0x9   :  { %448 = vmatprep.mubr.msk.f32.mxu0 %vm25_vm0, %v19_v5 }
   0xc   :  { %449 = vmatmul.mubr.msk.f32.gmra.mrb[2].mxu0 %vm25_vm0, %v20_v6 }
   0xd   :  { %451 = vmatprep.mubr.msk.f32.mxu0 %vm25_vm0, %v21_v7 }
  0x10   :  { %452 = vmatmul.mubr.msk.f32.gmra.mrb[4].mxu0 %vm25_vm0, %v22_v8 }
  0xdb   :  { %v447_v11 = vpop.f32.mrb[0].mxu0 }
  0xdc   :  { %v110_v12 = vpop.f32.mrb[1].mxu0 }
  0xdd   :  { %456 = vmatprep.mubr.msk.f32.mxu1 %vm147_vm1, %v110_v12 }
  0xde   :  { %457 = vmatmul.mubr.msk.f32.vlgmr.msra.gmra.mrb[0].mxu1 %vm147_vm1, %v447_v11 }
  0xdf   :  { %460 = vmatpush3.msra.mxu1 %v418_v10  ;;  %v450_v14 = vpop.f32.mrb[2].mxu0 }
  0xe0   :  { %v120_v15 = vpop.f32.mrb[3].mxu0  ;;  %464 = vmatprep.subr.mxu1 %v421_v13 }
  0xe1   :  { %461 = vmatprep.mubr.msk.f32.mxu1 %vm147_vm1, %v120_v15 }
  0xe3   :  { %v453_v16 = vpop.f32.mrb[4].mxu0 }
  0xe4   :  { %v130_v17 = vpop.f32.mrb[5].mxu0 }
  0xe6   :  { %462 = vmatmul.mubr.msk.f32.vlgmr.msra.gmra.mrb[0].mxu1 %vm147_vm1, %v450_v14 }
  0xe7   :  { %465 = vmatpush3.msra.mxu1 %v421_v13  ;;  %466 = vmatprep.mubr.msk.f32.mxu1 %vm147_vm1, %v130_v17 }
  0xee   :  { %467 = vmatmul.mubr.msk.f32.vlgmr.msra.gmra.mrb[0].mxu1 %vm147_vm1, %v453_v16 }
 0x1c1   :  { %v468_v19 = vpop.f32.mrb[0].mxu1 }
 0x1c2   :  { %v473_v20 = vadd.f32 %v468_v19, %v415_v18  ;;  %v390_v21 = vpop.f32.mrb[1].mxu1 }
 0x1c3   :  { %v474_v22 = vadd.f32 %v415_v18, %v390_v21 }
 0x1c4   :  { %v402_v23 = vmax.f32 %v473_v20, 0.0 }
 0x1c5   :  { %v401_v24 = vmax.f32 %v474_v22, 0.0 }
 0x1c6   :  { %404 = vst [vmem:[%s562_s4 + $0x8] sm:$0xff] %v402_v23 }
 0x1c7   :  { %403 = vst [vmem:[%s562_s4] sm:$0xff] %v401_v24 }

</bundles_post_ra>
